<compile_context>
chip_gen: v7x
topology: tpu7x:2x2x1
jax: 0.10.0
libtpu: 0.0.40
codegen_flags: <defaults>
</compile_context>

<pallas_src>
import functools

import jax
import jax.numpy as jnp
from jax.experimental import pallas as pl
from jax.experimental.pallas import tpu as pltpu


def _affine_shift_kernel(mode, num_inputs,
                         xt_ref, ct_ref,
                         w1t_ref, b1t_ref, w2t_ref, b2t_ref,
                         yt_ref, lgt_ref):
    """One lane-tile of batch, transposed (batch-on-lane) layout.

    xt  [D,  TB]   ct  [C,  TB]
    w1t [H,  C ]   b1t [H,  1 ]
    w2t [2D, H ]   b2t [2D, 1 ]
    yt  [D,  TB]   lgt [D,  TB]
    """
    x_t = xt_ref[...]
    c_t = ct_ref[...]

    # hidden^T = relu(W1^T @ cond^T + b1^T)                         [H, TB]
    h_t = jnp.maximum(
        jnp.dot(w1t_ref[...], c_t, preferred_element_type=jnp.float32)
        + b1t_ref[...],
        0.0)

    # fused second Linear: out^T = W2^T @ hidden^T + b2^T           [2D, TB]
    out_t = (jnp.dot(w2t_ref[...], h_t, preferred_element_type=jnp.float32)
             + b2t_ref[...])

    # torch.chunk(2, -1): first D outputs are log_gamma, last D are beta.
    # In the transposed layout this is a static sublane slice (free-ish).
    lg_t = out_t[:num_inputs]
    beta_t = out_t[num_inputs:]

    if mode == "direct":
        yt_ref[...] = jnp.exp(lg_t) * x_t + beta_t
        lgt_ref[...] = lg_t
    else:  # 'inverse'
        yt_ref[...] = (x_t - beta_t) * jnp.exp(-lg_t)
        lgt_ref[...] = -lg_t


def _round_up(n, m):
    return ((n + m - 1) // m) * m


def affine_shift_forward(inputs, cond_inputs, params, mode="direct",
                         block_b=4096):
    """Pallas implementation of AffineShift.forward (float32).

    inputs       : [B, D]   (D = num_inputs)
    cond_inputs  : [B, C]   (C = dim_cond)
    params       : dict with w1 [C,H], b1 [1,H], w2 [H,2D], b2 [1,2D]
    returns (y, log_gamma) in 'direct' mode, (x, -log_gamma) in 'inverse'.
    """
    B, D = inputs.shape
    C = cond_inputs.shape[1]
    H = params["w1"].shape[1]

    # --- lane-tile selection: batch sits on the 128-wide lane axis -------
    TB = min(block_b, _round_up(B, 128))
    TB = max(128, (TB // 128) * 128)
    # For mid-size batches cap the tile so the grid has >=2 steps and v7x's
    # second TensorCore gets work (neutral on v5e/v6e, no effect for huge B).
    if B > 2 * 128:
        TB = min(TB, _round_up(pl.cdiv(B, 2), 128))
    Bp = _round_up(B, TB)
    grid = (Bp // TB,)

    # --- wrapper-side layout plumbing: batch -> lane axis -----------------
    x_t = inputs.T                        # [D, B]
    c_t = cond_inputs.T                   # [C, B]
    if Bp != B:
        pad = Bp - B
        x_t = jnp.pad(x_t, ((0, 0), (0, pad)))
        c_t = jnp.pad(c_t, ((0, 0), (0, pad)))

    w1_t = params["w1"].T                 # [H, C]
    b1_t = params["b1"].T                 # [H, 1]
    w2_t = params["w2"].T                 # [2D, H]
    b2_t = params["b2"].T                 # [2D, 1]

    def lane_spec(rows):                  # streamed per batch-lane tile
        return pl.BlockSpec((rows, TB), lambda i: (0, i))

    def const_spec(shape):                # tiny weights: resident in VMEM
        return pl.BlockSpec(shape, lambda i: (0, 0))

    # Advisory cost for XLA scheduling.
    flops = 2 * Bp * C * H + 2 * Bp * H * (2 * D) + 6 * Bp * D
    transcendentals = Bp * D              # one exp per output element
    bytes_accessed = 4 * (Bp * (D + C) + 2 * Bp * D
                          + C * H + H + 2 * H * D + 2 * D)
    cost = pl.CostEstimate(flops=flops,
                           transcendentals=transcendentals,
                           bytes_accessed=bytes_accessed)

    y_t, lg_t = pl.pallas_call(
        functools.partial(_affine_shift_kernel, mode, D),
        out_shape=(
            jax.ShapeDtypeStruct((D, Bp), jnp.float32),
            jax.ShapeDtypeStruct((D, Bp), jnp.float32),
        ),
        grid=grid,
        in_specs=[
            lane_spec(D),                 # inputs^T
            lane_spec(C),                 # cond_inputs^T
            const_spec((H, C)),           # w1^T
            const_spec((H, 1)),           # b1^T
            const_spec((2 * D, H)),       # w2^T (fused log_gamma|beta)
            const_spec((2 * D, 1)),       # b2^T
        ],
        out_specs=(lane_spec(D), lane_spec(D)),
        compiler_params=pltpu.CompilerParams(
            dimension_semantics=("parallel",),   # megacore-shard lane tiles
        ),
        cost_estimate=cost,
    )(x_t, c_t, w1_t, b1_t, w2_t, b2_t)
    # TODO(synk): if xprof shows exposed DMA at depth 2, add
    # pipeline_mode=pl.Buffered(3) to lane_spec (a few hundred KiB of VMEM).

    y = y_t[:, :B].T
    lg = lg_t[:, :B].T
    return y, lg


def _reference_forward(inputs, cond_inputs, params, mode="direct"):
    """Plain-JAX reference mirroring the PyTorch module exactly."""
    h = jax.nn.relu(cond_inputs @ params["w1"] + params["b1"])
    out = h @ params["w2"] + params["b2"]
    log_gamma, beta = jnp.split(out, 2, axis=-1)
    if mode == "direct":
        return jnp.exp(log_gamma) * inputs + beta, log_gamma
    return (inputs - beta) / jnp.exp(log_gamma), -log_gamma


def _make_params(key, num_inputs, dim_cond, dim_hidden):
    """Deterministic synthetic parameters (shapes match the nn.Module)."""
    k1, k2, k3, k4 = jax.random.split(key, 4)
    w1 = 0.3 * jax.random.normal(k1, (dim_cond, dim_hidden), jnp.float32)
    b1 = 0.01 * jax.random.normal(k2, (1, dim_hidden), jnp.float32)
    w2 = 0.3 * jax.random.normal(k3, (dim_hidden, 2 * num_inputs), jnp.float32)
    b2 = 0.01 * jax.random.normal(k4, (1, 2 * num_inputs), jnp.float32)
    return dict(w1=w1, b1=b1, w2=w2, b2=b2)


if __name__ == "__main__":
    B, D, C, H = 8, 8, 4, 32   # batch, num_inputs, dim_cond, dim_hidden

    key = jax.random.PRNGKey(0)
    k_x, k_c, k_p = jax.random.split(key, 3)

    inputs = jax.random.normal(k_x, (B, D), jnp.float32)
    cond_inputs = jax.random.normal(k_c, (B, C), jnp.float32)
    params = _make_params(k_p, D, C, H)

    y, log_gamma = affine_shift_forward(inputs, cond_inputs, params,
                                        mode="direct")
    jax.block_until_ready((y, log_gamma))

    y_ref, lg_ref = _reference_forward(inputs, cond_inputs, params,
                                       mode="direct")
    assert y.shape == (B, D) and log_gamma.shape == (B, D)
    assert jnp.allclose(y, y_ref, atol=1e-5, rtol=1e-5)
    assert jnp.allclose(log_gamma, lg_ref, atol=1e-5, rtol=1e-5)

    # inverse mode must invert direct mode exactly (and negate log_gamma)
    x_rec, neg_lg = affine_shift_forward(y, cond_inputs, params,
                                         mode="inverse")
    jax.block_until_ready((x_rec, neg_lg))
    assert jnp.allclose(x_rec, inputs, atol=1e-4, rtol=1e-4)
    assert jnp.allclose(neg_lg, -lg_ref, atol=1e-5, rtol=1e-5)

    # also exercise a multi-tile grid with padding (B not a multiple of TB)
    B2 = 300
    kx2, kc2 = jax.random.split(jax.random.PRNGKey(1))
    x2 = jax.random.normal(kx2, (B2, D), jnp.float32)
    c2 = jax.random.normal(kc2, (B2, C), jnp.float32)
    y2, lg2 = affine_shift_forward(x2, c2, params, mode="direct", block_b=128)
    jax.block_until_ready((y2, lg2))
    y2_ref, lg2_ref = _reference_forward(x2, c2, params, mode="direct")
    assert jnp.allclose(y2, y2_ref, atol=1e-5, rtol=1e-5)
    assert jnp.allclose(lg2, lg2_ref, atol=1e-5, rtol=1e-5)

    print("KERNEL_OK")
</pallas_src>

<mosaic_0001>
module attributes {stable_mosaic.version = 11 : i64} {
  func.func @_affine_shift_kernel(%arg0: i32, %arg1: memref<8x128xf32, #tpu.memory_space<vmem>>, %arg2: memref<4x128xf32, #tpu.memory_space<vmem>>, %arg3: memref<32x4xf32, #tpu.memory_space<vmem>>, %arg4: memref<32x1xf32, #tpu.memory_space<vmem>>, %arg5: memref<16x32xf32, #tpu.memory_space<vmem>>, %arg6: memref<16x1xf32, #tpu.memory_space<vmem>>, %arg7: memref<8x128xf32, #tpu.memory_space<vmem>>, %arg8: memref<8x128xf32, #tpu.memory_space<vmem>>) attributes {dimension_semantics = [#tpu.dimension_semantics<parallel>], iteration_bounds = array<i64: 1>, scalar_prefetch = 0 : i64, scratch_operands = 0 : i64, tpu.core_type = #tpu.core_type<tc>, window_params = [{transform_indices = @transform_0, window_bounds = array<i64: 8, 128>}, {transform_indices = @transform_1, window_bounds = array<i64: 4, 128>}, {pipeline_mode = #tpu.pipeline_mode<synchronous>, transform_indices = @transform_2, window_bounds = array<i64: 32, 4>}, {pipeline_mode = #tpu.pipeline_mode<synchronous>, transform_indices = @transform_3, window_bounds = array<i64: 32, 1>}, {pipeline_mode = #tpu.pipeline_mode<synchronous>, transform_indices = @transform_4, window_bounds = array<i64: 16, 32>}, {pipeline_mode = #tpu.pipeline_mode<synchronous>, transform_indices = @transform_5, window_bounds = array<i64: 16, 1>}, {transform_indices = @transform_6, window_bounds = array<i64: 8, 128>}, {transform_indices = @transform_7, window_bounds = array<i64: 8, 128>}]} {
    %c0 = arith.constant 0 : index
    %c0_0 = arith.constant 0 : index
    %0 = vector.load %arg1[%c0, %c0_0] : memref<8x128xf32, #tpu.memory_space<vmem>>, vector<8x128xf32>
    %c0_1 = arith.constant 0 : index
    %c0_2 = arith.constant 0 : index
    %1 = vector.load %arg2[%c0_1, %c0_2] : memref<4x128xf32, #tpu.memory_space<vmem>>, vector<4x128xf32>
    %c0_3 = arith.constant 0 : index
    %c0_4 = arith.constant 0 : index
    %2 = vector.load %arg3[%c0_3, %c0_4] : memref<32x4xf32, #tpu.memory_space<vmem>>, vector<32x4xf32>
    %cst = arith.constant dense<0.000000e+00> : vector<32x128xf32>
    %3 = tpu.matmul %2, %1, %cst {dimension_numbers = #tpu.dot_dimension_numbers<[1], [0], [0], [1], [0, 0, 1, 1], [], []>} : vector<32x4xf32>, vector<4x128xf32>, vector<32x128xf32> -> vector<32x128xf32>
    %c0_5 = arith.constant 0 : index
    %c0_6 = arith.constant 0 : index
    %4 = vector.load %arg4[%c0_5, %c0_6] : memref<32x1xf32, #tpu.memory_space<vmem>>, vector<32x1xf32>
    %5 = vector.broadcast %4 : vector<32x1xf32> to vector<32x128xf32>
    %6 = arith.addf %3, %5 : vector<32x128xf32>
    %cst_7 = arith.constant 0.000000e+00 : f32
    %7 = vector.broadcast %cst_7 : f32 to vector<32x128xf32>
    %8 = arith.maximumf %6, %7 : vector<32x128xf32>
    %c0_8 = arith.constant 0 : index
    %c0_9 = arith.constant 0 : index
    %9 = vector.load %arg5[%c0_8, %c0_9] : memref<16x32xf32, #tpu.memory_space<vmem>>, vector<16x32xf32>
    %cst_10 = arith.constant dense<0.000000e+00> : vector<16x128xf32>
    %10 = tpu.matmul %9, %8, %cst_10 {dimension_numbers = #tpu.dot_dimension_numbers<[1], [0], [0], [1], [0, 0, 1, 1], [], []>} : vector<16x32xf32>, vector<32x128xf32>, vector<16x128xf32> -> vector<16x128xf32>
    %c0_11 = arith.constant 0 : index
    %c0_12 = arith.constant 0 : index
    %11 = vector.load %arg6[%c0_11, %c0_12] : memref<16x1xf32, #tpu.memory_space<vmem>>, vector<16x1xf32>
    %12 = vector.broadcast %11 : vector<16x1xf32> to vector<16x128xf32>
    %13 = arith.addf %10, %12 : vector<16x128xf32>
    %14 = vector.extract_strided_slice %13 {offsets = [0, 0], sizes = [8, 128], strides = [1, 1]} : vector<16x128xf32> to vector<8x128xf32>
    %15 = vector.extract_strided_slice %13 {offsets = [8, 0], sizes = [8, 128], strides = [1, 1]} : vector<16x128xf32> to vector<8x128xf32>
    %16 = math.exp %14 : vector<8x128xf32>
    %17 = arith.mulf %16, %0 : vector<8x128xf32>
    %18 = arith.addf %17, %15 : vector<8x128xf32>
    %c0_13 = arith.constant 0 : index
    %c0_14 = arith.constant 0 : index
    %19 = vector.load %arg7[%c0_13, %c0_14] : memref<8x128xf32, #tpu.memory_space<vmem>>, vector<8x128xf32>
    tpu.vector_store %arg7[%c0_13, %c0_14], %18 {strides = array<i32>} : memref<8x128xf32, #tpu.memory_space<vmem>>, vector<8x128xf32>,
    %c0_15 = arith.constant 0 : index
    %c0_16 = arith.constant 0 : index
    %20 = vector.load %arg8[%c0_15, %c0_16] : memref<8x128xf32, #tpu.memory_space<vmem>>, vector<8x128xf32>
    tpu.vector_store %arg8[%c0_15, %c0_16], %14 {strides = array<i32>} : memref<8x128xf32, #tpu.memory_space<vmem>>, vector<8x128xf32>,
    return
  }
  func.func @transform_0(%arg0: i32) -> (i32, i32) {
    %c0_i32 = arith.constant 0 : i32
    %c0_i32_0 = arith.constant 0 : i32
    return %c0_i32, %arg0 : i32, i32
  }
  func.func @transform_1(%arg0: i32) -> (i32, i32) {
    %c0_i32 = arith.constant 0 : i32
    %c0_i32_0 = arith.constant 0 : i32
    return %c0_i32, %arg0 : i32, i32
  }
  func.func @transform_2(%arg0: i32) -> (i32, i32) {
    %c0_i32 = arith.constant 0 : i32
    %c0_i32_0 = arith.constant 0 : i32
    %c0_i32_1 = arith.constant 0 : i32
    return %c0_i32, %c0_i32_0 : i32, i32
  }
  func.func @transform_3(%arg0: i32) -> (i32, i32) {
    %c0_i32 = arith.constant 0 : i32
    %c0_i32_0 = arith.constant 0 : i32
    %c0_i32_1 = arith.constant 0 : i32
    return %c0_i32, %c0_i32_0 : i32, i32
  }
  func.func @transform_4(%arg0: i32) -> (i32, i32) {
    %c0_i32 = arith.constant 0 : i32
    %c0_i32_0 = arith.constant 0 : i32
    %c0_i32_1 = arith.constant 0 : i32
    return %c0_i32, %c0_i32_0 : i32, i32
  }
  func.func @transform_5(%arg0: i32) -> (i32, i32) {
    %c0_i32 = arith.constant 0 : i32
    %c0_i32_0 = arith.constant 0 : i32
    %c0_i32_1 = arith.constant 0 : i32
    return %c0_i32, %c0_i32_0 : i32, i32
  }
  func.func @transform_6(%arg0: i32) -> (i32, i32) {
    %c0_i32 = arith.constant 0 : i32
    %c0_i32_0 = arith.constant 0 : i32
    return %c0_i32, %arg0 : i32, i32
  }
  func.func @transform_7(%arg0: i32) -> (i32, i32) {
    %c0_i32 = arith.constant 0 : i32
    %c0_i32_0 = arith.constant 0 : i32
    return %c0_i32, %arg0 : i32, i32
  }
}

</mosaic_0001>

<bundles_post_ra>
// kernel: tpu_custom_call.1
= control target key start
LH: loop header
LB: loop body
LE: loop exit
PB: predicated region body
PF: predicated region fallthrough
CT: control target
= control target key end

     0   :  { %13 = vsyncpa [#allocation3], 0  ;;  %vm70_vm0 = vcmask 1043456   ;;  %vm57_vm1 = vcmask 31744   ;;  %v393_v5 = vmov 0   ;;  %s508_s0 = inlined_call_operand.vmem [shape: f32[8,128], index: 0, kind: input, shape index: {}]   ;;  %s509_s1 = inlined_call_operand.vmem [shape: f32[4,128], index: 1, kind: input, shape index: {}]   ;;  %s510_s2 = inlined_call_operand.vmem [shape: f32[32,4], index: 2, kind: input, shape index: {}]   ;;  %s511_s3 = inlined_call_operand.vmem [shape: f32[32,1], index: 3, kind: input, shape index: {}]   ;;  %s512_s4 = inlined_call_operand.vmem [shape: f32[16,32], index: 4, kind: input, shape index: {}]   ;;  %s513_s5 = inlined_call_operand.vmem [shape: f32[16,1], index: 5, kind: input, shape index: {}]   ;;  %s514_s6 = inlined_call_operand.hbm [shape: f32[8,128], index: 6, kind: output, shape index: {0}]   ;;  %s515_s7 = inlined_call_operand.hbm [shape: f32[8,128], index: 7, kind: output, shape index: {1}]  }
   0x1   :  { %v28_v0 = vld [vmem:[%s509_s1] sm:$0xf]  ;;  %v30_v2 = vld [vmem:[%s510_s2 + $0x8] sm:$0xff]  ;;  %v31_v3 = vld [vmem:[%s510_s2 + $0x10] sm:$0xff]  ;;  %341 = vset.pattern.permute.xlu0 %v393_v5 }
   0x2   :  { %v29_v1 = vld [vmem:[%s510_s2] sm:$0xff]  ;;  %311 = vmatprep.subr.msk.mxu0 %vm70_vm0, %v28_v0  ;;  %v35_v6 = vld [vmem:[%s511_s3 + $0x10] sm:$0xff] }
   0x3   :  { %313 = vmatprep.mubr.msk.f32.mxu0 %vm57_vm1, %v29_v1  ;;  %v33_v4 = vld [vmem:[%s511_s3] sm:$0xff]  ;;  %312 = vmatpush3.msk.msra.mxu0 %vm70_vm0, %v28_v0 }
   0x4   :  { %314 = vmatmul.mubr.msk.f32.vlgmr.msra.gmra.mrb[0].mxu0 %vm57_vm1, %v30_v2  ;;  %39 = vperm.xlu0 %341, %v33_v4  }
   0x5   :  { %14 = vsyncpa [#allocation5], 0  ;;  %316 = vmatprep.mubr.msk.f32.mxu0 %vm57_vm1, %v31_v3  ;;  %v32_v7 = vld [vmem:[%s510_s2 + $0x18] sm:$0xff]  ;;  %342 = vset.pattern.permute.xlu1 %v393_v5  ;;  %v34_v8 = vld [vmem:[%s511_s3 + $0x8] sm:$0xff]  ;;  %vm177_vm2 = vcmask 261120   ;;  %s394_s23 = smov [#allocation4]  }
   0x6   :  { %49 = vperm.xlu1 %342, %v35_v6   ;;  %v36_v9 = vld [vmem:[%s511_s3 + $0x18] sm:$0xff]  ;;  %v165_v10 = vld [vmem:[%s513_s5] sm:$0xff]  ;;  %v166_v11 = vld [vmem:[%s513_s5 + $0x8] sm:$0xff]  ;;  %s281_s24 = sshll.u32 %s394_s23, 4  ;;  %s282_s24 = int_to_ptr.vmem [resolvable:$true] %s281_s24 }
   0x7   :  { %v163_v12 = vld [vmem:[%s512_s4] sm:$0xff]  ;;  %v164_v31 = vld [vmem:[%s512_s4 + $0x8] sm:$0xff]  ;;  %s345_s25 = scalar_lea.vmem %s282_s24, 128  ;;  %p350_p1 = scmp.lt.s32.totalorder %s282_s24, %s282_s24 }
   0x8   :  { %317 = vmatmul.mubr.msk.f32.gmra.mrb[2].mxu0 %vm57_vm1, %v32_v7  ;;  %44 = vperm.xlu0 %341, %v34_v8   ;;  %p346_p0 = scmp.ne.s32.totalorder %s282_s24, %s345_s25  ;;  %p351_p2 = scmp.lt.s32.totalorder %s345_s25, %s345_s25 }
   0x9   :  { %327 = vmatprep.mubr.msk.f32.mxu1 %vm177_vm2, %v163_v12 }
   0xa   :  { %54 = vperm.xlu1 %342, %v36_v9   ;;  %p352_p3 = por %p351_p2, %p350_p1 }
   0xc   :  { %169 = vperm.xlu0 %341, %v165_v10   ;;  %p353_p4 = pnand %p352_p3, %p346_p0 }
   0xe   :  { %174 = vperm.xlu1 %342, %v166_v11  }
  0x83   :  { %v40_v13 = vpop.permute.xlu0 %39 }
  0x85   :  { %v50_v14 = vpop.permute.xlu1 %49 }
  0x87   :  { %v45_v15 = vpop.permute.xlu0 %44 }
  0x89   :  { %v55_v21 = vpop.permute.xlu1 %54 }
  0x8b   :  { %v170_v33 = vpop.permute.xlu0 %169 }
  0xd7   :  { %v315_v16 = vpop.f32.mrb[0].mxu0 }
  0xd8   :  { %v146_v17 = vadd.f32 %v315_v16, %v45_v15  ;;  %v140_v18 = vpop.f32.mrb[1].mxu0 }
  0xd9   :  { %v141_v19 = vadd.f32 %v140_v18, %v40_v13 }
  0xda   :  { %v160_v20 = vmax.f32 %v146_v17, 0.0 }
  0xdb   :  { %v159_v22 = vmax.f32 %v141_v19, 0.0  ;;  %v318_v23 = vpop.f32.mrb[2].mxu0 }
  0xdc   :  { %v156_v24 = vadd.f32 %v318_v23, %v55_v21  ;;  %v150_v25 = vpop.f32.mrb[3].mxu0 }
  0xdd   :  { %v151_v26 = vadd.f32 %v150_v25, %v50_v14  ;;  %v330_v27 = vpack.c.bf16 %v160_v20, %v159_v22 }
  0xde   :  { %v162_v28 = vmax.f32 %v156_v24, 0.0 }
  0xdf   :  { %v161_v29 = vmax.f32 %v151_v26, 0.0  ;;  %331 = vmatprep.subr.bf16.mxu1 %v330_v27 }
  0xe0   :  { %333 = vmatpush3.bf16.msra.mxu1 %v330_v27 }
  0xe1   :  { %v334_v30 = vpack.c.bf16 %v162_v28, %v161_v29 }
  0xe3   :  { %335 = vmatprep.subr.bf16.mxu1 %v334_v30 }
  0xe4   :  { %337 = vmatpush3.bf16.msra.mxu1 %v334_v30 }
  0xe7   :  { %328 = vmatmul.mubr.msk.f32.vlgmr.msra.gmra.mrb[0].mxu1 %vm177_vm2, %v164_v31 }
 0x1ba   :  { %v329_v32 = vpop.f32.mrb[0].mxu1 }
 0x1bb   :  { %v250_v34 = vpop.f32.mrb[1].mxu1 }
 0x1bc   :  { %v251_v35 = vadd.f32 %v250_v34, %v170_v33 }
 0x1be   :  { %v259_v36 = vmul.f32 1.442695, %v251_v35  ;;  %264 = vst [vmem:[#allocation4] sm:$0xff] %v251_v35 }
 0x1bf   :  { %356 = shalt.err (!%p353_p4)
}
 0x1c0   :  { %s357_s27 = scalar_lea.hbm %s515_s7, 128 }
 0x1c1   :  { %p358_p5 = scmp.ne.s32.totalorder %s515_s7, %s357_s27  ;;  %p361_p6 = scmp.lt.u32.totalorder %s357_s27, %s515_s7 }
 0x1c3   :  { %p363_p7 = pnand %p361_p6, %p358_p5 }
 0x1c5   :  { %366 = shalt.err (!%p363_p7)
}
 0x1c6   :  { %284 = dma.vmem_to_hbm [thread:$0]  %s282_s24, 128, %s515_s7, [#allocation5]   ;;  %343 = vpow2.f32 %v259_v36  ;;  %v27_v37 = vld [vmem:[%s508_s0] sm:$0xff]  ;;  %v175_v39 = vpop.permute.xlu1 %174 }
 0x1c7   :  { %s395_s12 = smov [#allocation2]   ;;  %v256_v40 = vadd.f32 %v329_v32, %v175_v39 }
 0x1c8   :  { %s271_s13 = sshll.u32 %s395_s12, 4  ;;  %s272_s13 = int_to_ptr.vmem [resolvable:$true] %s271_s13 }
 0x1c9   :  { %s367_s14 = scalar_lea.vmem %s272_s13, 128  ;;  %p372_p9 = scmp.lt.s32.totalorder %s272_s13, %s272_s13 }
 0x1ca   :  { %p368_p8 = scmp.ne.s32.totalorder %s272_s13, %s367_s14  ;;  %p373_p10 = scmp.lt.s32.totalorder %s367_s14, %s367_s14 }
 0x1cc   :  { %p374_p11 = por %p373_p10, %p372_p9 }
 0x1ce   :  { %p375_p12 = pnand %p374_p11, %p368_p8 }
 0x1d0   :  { %v344_v38 = vpop.eup %343 }
 0x1d1   :  { %v261_v41 = vmul.f32 %v344_v38, %v27_v37 }
 0x1d3   :  { %v262_v42 = vadd.f32 %v261_v41, %v256_v40 }
 0x1d5   :  { %263 = vst [vmem:[#allocation2] sm:$0xff] %v262_v42 }
 0x1d6   :  { %378 = shalt.err (!%p375_p12)
}
 0x1d7   :  { %s379_s0 = scalar_lea.hbm %s514_s6, 128 }
 0x1d8   :  { %p380_p13 = scmp.ne.s32.totalorder %s514_s6, %s379_s0  ;;  %p383_p0 = scmp.lt.u32.totalorder %s379_s0, %s514_s6 }
 0x1da   :  { %p385_p1 = pnand %p383_p0, %p380_p13 }
 0x1dc   :  { %388 = shalt.err (!%p385_p1)
}
 0x1dd   :  { %274 = dma.vmem_to_hbm [thread:$0]  %s272_s13, 128, %s514_s6, [#allocation3]  }
 0x1de   :  { %389 = dma.done.wait [#allocation3], 128  }
 0x1df   :  { %390 = vsyncadd [#allocation3], 4294967168 }
 0x1e0   :  { %391 = dma.done.wait [#allocation5], 128  }
 0x1e1   :  { %392 = vsyncadd [#allocation5], 4294967168 }
 0x1e2   :  { %291 = vsyncpa [#allocation3], 1 }
 0x1e3   :  { %292 = vsyncpa [#allocation5], 1 }

</bundles_post_ra>
